<compile_context>
chip_gen: v7x
topology: tpu7x:2x2x1
jax: 0.10.0
libtpu: 0.0.40
codegen_flags: <defaults>
</compile_context>

<pallas_src>
import functools

import jax
import jax.numpy as jnp
from jax.experimental import pallas as pl
from jax.experimental.pallas import tpu as pltpu

_EPS = 1e-6          # PairwiseDistance default eps
NUM_SPLITS = 2       # >= TensorCores per chip (v7x has 2); harmless on 1-TC chips


def _triplet_loss_kernel(a_ref, p_ref, n_ref, o_ref, acc_ref, *,
                         margin, batch, tile_b, steps_per_split, num_blocks,
                         inv_batch, needs_mask):
    core = pl.program_id(0)          # parallel axis (TensorCore split)
    step = pl.program_id(1)          # sequential reduction axis

    @pl.when(step == 0)
    def _init():
        acc_ref[...] = jnp.zeros_like(acc_ref)

    a = a_ref[...].astype(jnp.float32)
    p = p_ref[...].astype(jnp.float32)
    n = n_ref[...].astype(jnp.float32)

    # torch.pairwise_distance: ||x1 - x2 + eps||_2 along the last dim.
    diff_ap = a - p + _EPS
    diff_an = a - n + _EPS
    d_ap = jnp.sqrt(jnp.sum(diff_ap * diff_ap, axis=-1, keepdims=True))  # (TB, 1)
    d_an = jnp.sqrt(jnp.sum(diff_an * diff_an, axis=-1, keepdims=True))  # (TB, 1)

    hinge = jnp.maximum(d_ap - d_an + margin, 0.0)                       # (TB, 1)

    if needs_mask:  # trace-time gate: only emitted when padding actually exists
        linear = core * steps_per_split + step
        # index_map clamps the block the same way, so the data actually loaded
        # for an overhanging grid step is a re-read of the last real block;
        # (linear < num_blocks) zeroes its contribution, (row < batch) zeroes
        # the ragged tail of the last real block.
        blk_start = jnp.minimum(linear, num_blocks - 1) * tile_b
        row = jax.lax.broadcasted_iota(jnp.int32, hinge.shape, 0) + blk_start
        keep = (row < batch) & (linear < num_blocks)
        hinge = jnp.where(keep, hinge, 0.0)   # select, so NaN garbage is dropped

    acc_ref[...] += jnp.sum(hinge, axis=0, keepdims=True)                # (1, 1)

    @pl.when(step == pl.num_programs(1) - 1)
    def _finalize():
        # Per-core partial mean (sum * 1/B, B static). Broadcast over the
        # lane-dense (8, 128) output block owned by this core.
        o_ref[...] = jnp.broadcast_to(acc_ref[...] * inv_batch, o_ref.shape)


def _round_up(x, m):
    return -(-x // m) * m


def _vmem_capacity_bytes():
    try:
        return int(pltpu.get_tpu_info().vmem_capacity_bytes)
    except Exception:
        return 64 << 20  # conservative fallback: v7x physical VMEM


def _pick_batch_tile(batch, feature, itemsize, num_splits, budget_bytes):
    """Largest legal batch tile whose VMEM footprint fits the budget.

    Footprint per batch row: 3 inputs x 2 pipeline buffers x D x itemsize for
    the BlockSpec double-buffering, plus ~6 x D x 4 B of live f32 temporaries
    inside the kernel (a/p/n upcasts + diff_ap/diff_an + slack).
    """
    sub = max(8, 32 // max(itemsize, 1))   # sublane multiple: 8 f32 / 16 bf16 / 32 int8
    per_row = 3 * 2 * feature * itemsize + 6 * feature * 4
    tb = (budget_bytes // max(per_row, 1)) // sub * sub
    tb = max(tb, sub)
    # Balance work across the parallel splits (no-op on 1-TC chips).
    tb = min(tb, _round_up(pl.cdiv(batch, num_splits), sub))
    if tb >= batch:
        return batch            # single full-extent block (always a legal shape)
    return tb


def triplet_loss(anchor, positive, negative, margin, *, tile_b=None):
    """Pallas TripletLoss forward. anchor/positive/negative: (B, D)."""
    assert anchor.shape == positive.shape == negative.shape
    assert anchor.ndim == 2
    B, D = anchor.shape
    itemsize = anchor.dtype.itemsize

    cap = _vmem_capacity_bytes()
    budget = (cap * 7) // 10                       # ~45 MiB v7x, ~90 MiB v5e/v6e
    if tile_b is None:
        tile_b = _pick_batch_tile(B, D, itemsize, NUM_SPLITS, budget)

    num_blocks = pl.cdiv(B, tile_b)
    steps_per_split = pl.cdiv(num_blocks, NUM_SPLITS)
    grid = (NUM_SPLITS, steps_per_split)
    needs_mask = (NUM_SPLITS * steps_per_split * tile_b) != B

    kernel = functools.partial(
        _triplet_loss_kernel,
        margin=float(margin),
        batch=B,
        tile_b=tile_b,
        steps_per_split=steps_per_split,
        num_blocks=num_blocks,
        inv_batch=1.0 / float(B),
        needs_mask=needs_mask,
    )

    def in_index_map(c, i):
        linear = c * steps_per_split + i
        # Clamp so no block window starts out of bounds (overhanging grid steps
        # re-read the last real block and are masked to zero in the kernel).
        return (jnp.minimum(linear, num_blocks - 1), 0)

    in_spec = pl.BlockSpec((tile_b, D), in_index_map)
    # Each parallel split owns one lane-dense (8, 128) output block.
    out_spec = pl.BlockSpec((8, 128), lambda c, i: (c, 0))

    vmem_limit = int(min(cap - (4 << 20), budget + (8 << 20)))
    cost = pl.CostEstimate(
        flops=8 * B * D,
        transcendentals=2 * B,
        bytes_accessed=3 * B * D * itemsize + NUM_SPLITS * 8 * 128 * 4,
    )

    out = pl.pallas_call(
        kernel,
        out_shape=jax.ShapeDtypeStruct((NUM_SPLITS * 8, 128), jnp.float32),
        grid_spec=pltpu.PrefetchScalarGridSpec(
            num_scalar_prefetch=0,
            grid=grid,
            in_specs=[in_spec, in_spec, in_spec],
            out_specs=out_spec,
            scratch_shapes=[pltpu.VMEM((1, 1), jnp.float32)],
        ),
        compiler_params=pltpu.CompilerParams(
            dimension_semantics=("parallel", "arbitrary"),
            vmem_limit_bytes=vmem_limit,
        ),
        cost_estimate=cost,
    )(anchor, positive, negative)

    # Each split's (8, 128) block holds its partial mean; sum the partials.
    partials = out.reshape(NUM_SPLITS, 8, 128)[:, 0, 0]
    return jnp.sum(partials)


def triplet_loss_ref(anchor, positive, negative, margin):
    """Pure-JAX reference mirroring the PyTorch module."""
    d_ap = jnp.sqrt(jnp.sum((anchor - positive + _EPS) ** 2, axis=-1))
    d_an = jnp.sqrt(jnp.sum((anchor - negative + _EPS) ** 2, axis=-1))
    return jnp.mean(jnp.maximum(d_ap - d_an + margin, 0.0))


if __name__ == "__main__":
    key = jax.random.PRNGKey(0)
    margin = 0.2  # deterministic module hyperparameter

    # Case 1: small batch of 128-dim embeddings (single real block per chip).
    B, D = 8, 128
    ka, kp, kn = jax.random.split(key, 3)
    anchor = jax.random.normal(ka, (B, D), dtype=jnp.float32)
    positive = jax.random.normal(kp, (B, D), dtype=jnp.float32)
    negative = jax.random.normal(kn, (B, D), dtype=jnp.float32)

    loss = triplet_loss(anchor, positive, negative, margin)
    jax.block_until_ready(loss)
    ref = triplet_loss_ref(anchor, positive, negative, margin)
    assert jnp.allclose(loss, ref, rtol=1e-5, atol=1e-5), (loss, ref)

    # Case 2: multiple grid steps per split + ragged last tile + an
    # overhanging (clamped) grid step, exercising the masking paths.
    B2 = 20
    k2 = jax.random.split(key, 4)[3]
    ka2, kp2, kn2 = jax.random.split(k2, 3)
    anchor2 = jax.random.normal(ka2, (B2, D), dtype=jnp.float32)
    positive2 = jax.random.normal(kp2, (B2, D), dtype=jnp.float32)
    negative2 = jax.random.normal(kn2, (B2, D), dtype=jnp.float32)

    loss2 = triplet_loss(anchor2, positive2, negative2, margin, tile_b=8)
    jax.block_until_ready(loss2)
    ref2 = triplet_loss_ref(anchor2, positive2, negative2, margin)
    assert jnp.allclose(loss2, ref2, rtol=1e-5, atol=1e-5), (loss2, ref2)

    print("KERNEL_OK")
</pallas_src>

<mosaic_0001>
module attributes {stable_mosaic.version = 11 : i64} {
  func.func @_triplet_loss_kernel(%arg0: i32, %arg1: i32, %arg2: memref<8x128xf32, #tpu.memory_space<vmem>>, %arg3: memref<8x128xf32, #tpu.memory_space<vmem>>, %arg4: memref<8x128xf32, #tpu.memory_space<vmem>>, %arg5: memref<8x128xf32, #tpu.memory_space<vmem>>, %arg6: memref<1x1xf32, #tpu.memory_space<vmem>>) attributes {dimension_semantics = [#tpu.dimension_semantics<parallel>, #tpu.dimension_semantics<arbitrary>], iteration_bounds = array<i64: 2, 1>, scalar_prefetch = 0 : i64, scratch_operands = 1 : i64, tpu.core_type = #tpu.core_type<tc>, window_params = [{transform_indices = @transform_0, window_bounds = array<i64: 8, 128>}, {transform_indices = @transform_1, window_bounds = array<i64: 8, 128>}, {transform_indices = @transform_2, window_bounds = array<i64: 8, 128>}, {transform_indices = @transform_3, window_bounds = array<i64: 8, 128>}]} {
    %c0_i32 = arith.constant 0 : i32
    %0 = arith.cmpi eq, %arg1, %c0_i32 : i32
    %1 = arith.extui %0 : i1 to i32
    %c0_i32_0 = arith.constant 0 : i32
    %2 = arith.cmpi ne, %1, %c0_i32_0 : i32
    scf.if %2 {
      %cst_22 = arith.constant 0.000000e+00 : f32
      %47 = vector.broadcast %cst_22 : f32 to vector<1x1xf32>
      %c0_23 = arith.constant 0 : index
      %c0_24 = arith.constant 0 : index
      %48 = vector.load %arg6[%c0_23, %c0_24] : memref<1x1xf32, #tpu.memory_space<vmem>>, vector<1x1xf32>
      tpu.vector_store %arg6[%c0_23, %c0_24], %47 {strides = array<i32>} : memref<1x1xf32, #tpu.memory_space<vmem>>, vector<1x1xf32>,
    } else {
    }
    %c0 = arith.constant 0 : index
    %c0_1 = arith.constant 0 : index
    %3 = vector.load %arg2[%c0, %c0_1] : memref<8x128xf32, #tpu.memory_space<vmem>>, vector<8x128xf32>
    %c0_2 = arith.constant 0 : index
    %c0_3 = arith.constant 0 : index
    %4 = vector.load %arg3[%c0_2, %c0_3] : memref<8x128xf32, #tpu.memory_space<vmem>>, vector<8x128xf32>
    %c0_4 = arith.constant 0 : index
    %c0_5 = arith.constant 0 : index
    %5 = vector.load %arg4[%c0_4, %c0_5] : memref<8x128xf32, #tpu.memory_space<vmem>>, vector<8x128xf32>
    %6 = arith.subf %3, %4 : vector<8x128xf32>
    %cst = arith.constant 9.99999997E-7 : f32
    %7 = vector.broadcast %cst : f32 to vector<8x128xf32>
    %8 = arith.addf %6, %7 : vector<8x128xf32>
    %9 = arith.subf %3, %5 : vector<8x128xf32>
    %cst_6 = arith.constant 9.99999997E-7 : f32
    %10 = vector.broadcast %cst_6 : f32 to vector<8x128xf32>
    %11 = arith.addf %9, %10 : vector<8x128xf32>
    %12 = arith.mulf %8, %8 : vector<8x128xf32>
    %cst_7 = arith.constant dense<0.000000e+00> : vector<8xf32>
    %13 = vector.multi_reduction <add>, %12, %cst_7 [1] : vector<8x128xf32> to vector<8xf32>
    %14 = vector.shape_cast %13 : vector<8xf32> to vector<8x1xf32>
    %15 = math.sqrt %14 : vector<8x1xf32>
    %16 = arith.mulf %11, %11 : vector<8x128xf32>
    %cst_8 = arith.constant dense<0.000000e+00> : vector<8xf32>
    %17 = vector.multi_reduction <add>, %16, %cst_8 [1] : vector<8x128xf32> to vector<8xf32>
    %18 = vector.shape_cast %17 : vector<8xf32> to vector<8x1xf32>
    %19 = math.sqrt %18 : vector<8x1xf32>
    %20 = arith.subf %15, %19 : vector<8x1xf32>
    %cst_9 = arith.constant 2.000000e-01 : f32
    %21 = vector.broadcast %cst_9 : f32 to vector<8x1xf32>
    %22 = arith.addf %20, %21 : vector<8x1xf32>
    %cst_10 = arith.constant 0.000000e+00 : f32
    %23 = vector.broadcast %cst_10 : f32 to vector<8x1xf32>
    %24 = arith.maximumf %22, %23 : vector<8x1xf32>
    %c1_i32 = arith.constant 1 : i32
    %25 = arith.muli %arg0, %c1_i32 : i32
    %26 = arith.addi %25, %arg1 : i32
    %c0_i32_11 = arith.constant 0 : i32
    %27 = arith.minsi %26, %c0_i32_11 : i32
    %c8_i32 = arith.constant 8 : i32
    %28 = arith.muli %27, %c8_i32 : i32
    %29 = tpu.iota {dimensions = array<i32: 0>} : vector<8x1xi32>
    %30 = vector.broadcast %28 : i32 to vector<8x1xi32>
    %31 = arith.addi %29, %30 : vector<8x1xi32>
    %c8_i32_12 = arith.constant 8 : i32
    %32 = vector.broadcast %c8_i32_12 : i32 to vector<8x1xi32>
    %33 = arith.cmpi slt, %31, %32 : vector<8x1xi32>
    %c1_i32_13 = arith.constant 1 : i32
    %34 = arith.cmpi slt, %26, %c1_i32_13 : i32
    %35 = vector.broadcast %34 : i1 to vector<8x1xi1>
    %36 = arith.andi %33, %35 : vector<8x1xi1>
    %cst_14 = arith.constant 0.000000e+00 : f32
    %37 = vector.broadcast %cst_14 : f32 to vector<8x1xf32>
    %38 = arith.select %36, %24, %37 : vector<8x1xi1>, vector<8x1xf32>
    %c0_15 = arith.constant 0 : index
    %c0_16 = arith.constant 0 : index
    %39 = vector.load %arg6[%c0_15, %c0_16] : memref<1x1xf32, #tpu.memory_space<vmem>>, vector<1x1xf32>
    %cst_17 = arith.constant dense<0.000000e+00> : vector<1xf32>
    %40 = vector.multi_reduction <add>, %38, %cst_17 [0] : vector<8x1xf32> to vector<1xf32>
    %41 = vector.shape_cast %40 : vector<1xf32> to vector<1x1xf32>
    %42 = arith.addf %39, %41 : vector<1x1xf32>
    %c0_18 = arith.constant 0 : index
    %c0_19 = arith.constant 0 : index
    %43 = vector.load %arg6[%c0_18, %c0_19] : memref<1x1xf32, #tpu.memory_space<vmem>>, vector<1x1xf32>
    tpu.vector_store %arg6[%c0_18, %c0_19], %42 {strides = array<i32>} : memref<1x1xf32, #tpu.memory_space<vmem>>, vector<1x1xf32>,
    %c0_i32_20 = arith.constant 0 : i32
    %44 = arith.cmpi eq, %arg1, %c0_i32_20 : i32
    %45 = arith.extui %44 : i1 to i32
    %c0_i32_21 = arith.constant 0 : i32
    %46 = arith.cmpi ne, %45, %c0_i32_21 : i32
    scf.if %46 {
      %c0_22 = arith.constant 0 : index
      %c0_23 = arith.constant 0 : index
      %47 = vector.load %arg6[%c0_22, %c0_23] : memref<1x1xf32, #tpu.memory_space<vmem>>, vector<1x1xf32>
      %cst_24 = arith.constant 1.250000e-01 : f32
      %48 = vector.broadcast %cst_24 : f32 to vector<1x1xf32>
      %49 = arith.mulf %47, %48 : vector<1x1xf32>
      %50 = vector.shape_cast %49 : vector<1x1xf32> to vector<1x1xf32>
      %51 = vector.broadcast %50 : vector<1x1xf32> to vector<8x128xf32>
      %c0_25 = arith.constant 0 : index
      %c0_26 = arith.constant 0 : index
      %52 = vector.load %arg5[%c0_25, %c0_26] : memref<8x128xf32, #tpu.memory_space<vmem>>, vector<8x128xf32>
      tpu.vector_store %arg5[%c0_25, %c0_26], %51 {strides = array<i32>} : memref<8x128xf32, #tpu.memory_space<vmem>>, vector<8x128xf32>,
    } else {
    }
    return
  }
  func.func @transform_0(%arg0: i32, %arg1: i32) -> (i32, i32) {
    %c1_i32 = arith.constant 1 : i32
    %0 = arith.muli %arg0, %c1_i32 : i32
    %1 = arith.addi %0, %arg1 : i32
    %c0_i32 = arith.constant 0 : i32
    %2 = arith.minsi %1, %c0_i32 : i32
    %c0_i32_0 = arith.constant 0 : i32
    %c0_i32_1 = arith.constant 0 : i32
    return %2, %c0_i32_0 : i32, i32
  }
  func.func @transform_1(%arg0: i32, %arg1: i32) -> (i32, i32) {
    %c1_i32 = arith.constant 1 : i32
    %0 = arith.muli %arg0, %c1_i32 : i32
    %1 = arith.addi %0, %arg1 : i32
    %c0_i32 = arith.constant 0 : i32
    %2 = arith.minsi %1, %c0_i32 : i32
    %c0_i32_0 = arith.constant 0 : i32
    %c0_i32_1 = arith.constant 0 : i32
    return %2, %c0_i32_0 : i32, i32
  }
  func.func @transform_2(%arg0: i32, %arg1: i32) -> (i32, i32) {
    %c1_i32 = arith.constant 1 : i32
    %0 = arith.muli %arg0, %c1_i32 : i32
    %1 = arith.addi %0, %arg1 : i32
    %c0_i32 = arith.constant 0 : i32
    %2 = arith.minsi %1, %c0_i32 : i32
    %c0_i32_0 = arith.constant 0 : i32
    %c0_i32_1 = arith.constant 0 : i32
    return %2, %c0_i32_0 : i32, i32
  }
  func.func @transform_3(%arg0: i32, %arg1: i32) -> (i32, i32) {
    %c0_i32 = arith.constant 0 : i32
    %c0_i32_0 = arith.constant 0 : i32
    return %arg0, %c0_i32 : i32, i32
  }
}

</mosaic_0001>

<bundles_post_ra>
// kernel: tpu_custom_call.1
= control target key start
LH: loop header
LB: loop body
LE: loop exit
PB: predicated region body
PF: predicated region fallthrough
CT: control target
= control target key end

     0   :  { %s1097_s0 = inlined_call_operand.hbm [shape: f32[8,128], index: 0, kind: input, shape index: {}]   ;;  %s1098_s1 = inlined_call_operand.hbm [shape: f32[8,128], index: 1, kind: input, shape index: {}]   ;;  %s1099_s2 = inlined_call_operand.hbm [shape: f32[8,128], index: 2, kind: input, shape index: {}]   ;;  %s1100_s3 = inlined_call_operand.hbm [shape: f32[16,128], index: 3, kind: output, shape index: {}]  }
   0x1   :  { %1106 = sst [smem:[#allocation14_spill]] %s1098_s1 }
   0x2   :  { %8 = vsyncpa [#allocation4], 0 }
   0x3   :  { %10 = vsyncpa [#allocation4 + $0x1], 0 }
   0x4   :  { %11 = vsyncpa [#allocation7], 0 }
   0x5   :  { %13 = vsyncpa [#allocation7 + $0x1], 0 }
   0x6   :  { %14 = vsyncpa [#allocation5], 0 }
   0x7   :  { %16 = vsyncpa [#allocation5 + $0x1], 0  ;;  %s865_s12 = smov 0   ;;  %s867_s13 = smov 0  }
   0x8   :  { %s869_s14 = smov 0   ;;  %s871_s15 = smov 0  }
   0x9   :  { %s873_s16 = smov 0   ;;  %s875_s17 = smov 0  }
   0xa   :  { %s877_s18 = smov 0   ;;  %s879_s19 = smov 0  }
   0xb LB: > { %s904_s20 = sadd.s32 4294967295, %s837_s19   ;;  %s517_s21 = sadd.s32 4294967294, %s837_s19   ;;  %s837_s19 = sphi %s879_s19, %s22_s19   ;;  %s833_s18 = sphi %s877_s18, %s1131_s18   ;;  %s829_s17 = sphi %s875_s17, %s1130_s17   ;;  %s825_s16 = sphi %s873_s16, %s1087_s16   ;;  %s821_s15 = sphi %s871_s15, %s1129_s15   ;;  %s817_s14 = sphi %s869_s14, %s1128_s14   ;;  %s813_s13 = sphi %s867_s13, %s1127_s13   ;;  %s809_s12 = sphi %s865_s12, %s1126_s12  }
   0xc   : > { %s34_s22 = sadd.s32 1, %s833_s18  ;;  %p806_p1 = scmp.ne.s32.totalorder %s825_s16, 0 }
   0xd   : > { %p36_p0 = scmp.ge.s32.totalorder %s34_s22, 2  ;;  %p55_p2 = scmp.eq.s32.totalorder %s837_s19, 0 }
   0xe   : > { %p60_p3 = scmp.ne.s32.totalorder %s825_s16, %s821_s15  ;;  %p61_p5 = scmp.eq.s32.totalorder %s904_s20, 0 }
   0xf   : > { %s1133_s22 = smov (%p36_p0, %s34_s22), 0  ;;  %p913_p4 = por %p806_p1, %p55_p2 }
  0x10   : > { %1107 = sst [smem:[#allocation13_spill]] %s1133_s22  ;;  %p918_p6 = por %p61_p5, %p60_p3 }
  0x11   : > { %s134_s25 = ssub.s32 %s833_s18, %s1133_s22  ;;  %s137_s26 = sadd.s32 1, %s817_s14 }
  0x12   : > { %s1109_s24 = scalar_select %p918_p6, 1, 0 }
  0x13   : > { %p135_p7 = scmp.eq.s32.totalorder %s134_s25, 0  ;;  %p147_p8 = scmp.ne.s32.totalorder %s817_s14, %s813_s13 }
  0x14   : > { %p148_p9 = scmp.eq.s32.totalorder %s904_s20, 1  ;;  %p153_p10 = scmp.ne.s32.totalorder %s813_s13, %s809_s12 }
  0x15   : > { %s926_s27 = scalar_select %p135_p7, %s817_s14, %s137_s26  }
  0x16   : > { %p154_p11 = scmp.eq.s32.totalorder %s517_s21, 1  ;;  %p933_p12 = por %p148_p9, %p147_p8 }
  0x17   : > { %p558_p1 = scmp.lt.s32.totalorder %s837_s19, 2  ;;  %s195_s4 = sand.u32 1, %s837_s19  }
  0x18   : > { %s1110_s28 = scalar_select %p933_p12, 1, 0 }
  0x19   : > { %p938_p0 = por %p154_p11, %p153_p10  ;;  %p945_p2 = pnand %p558_p1, %p913_p4 }
  0x1a   : > { %s839_s5 = smov [#allocation6]   ;;  %s951_s7 = scalar_lea.sflag [#allocation7], %s195_s4 }
  0x1b   : > { %s1111_s29 = scalar_select %p938_p0, 1, 0 }
  0x1c   : > { %s1112_s30 = scalar_select %p945_p2, 1, 0 }
  0x1d   : > { %s209_s6 = sshll.u32 %s839_s5, 4  ;;  %s1113_s1 = sld [smem:[#allocation14_spill]]  ;;  %s210_s6 = int_to_ptr.vmem [resolvable:$true] %s209_s6 }
  0x1e   : > { %p961_p4 = pneg %p945_p2 }
  0x23   : > { %s640_s10 = scalar_lea.hbm %s1113_s1, 128 }
  0x24   : > { %p641_p5 = scmp.ne.s32.totalorder %s1113_s1, %s640_s10  ;;  %p647_p9 = scmp.lt.u32.totalorder %s640_s10, %s640_s10 }
  0x25   : > { %p649_p10 = scmp.lt.u32.totalorder %s640_s10, %s1113_s1 }
  0x26   : > { %p643_p7 = pnand %p961_p4, %p641_p5 }
  0x27   : > { %p650_p11 = por %p649_p10, %p647_p9 }
  0x28   : > { %p644_p8 = pneg %p643_p7 }
  0x2a   : > { %p651_p1 = pnand %p650_p11, %p644_p8 }
  0x2c   : > { %654 = shalt.err (!%p651_p1)
}
  0x2d   : > { %s655_s26 = scalar_lea.vmem %s210_s6, 128  ;;  %s662_s4 = scalar_lea.vmem %s210_s6, 256 }
  0x2e   : > { %p656_p13 = scmp.ne.s32.totalorder %s210_s6, %s655_s26  ;;  %p663_p12 = scmp.lt.s32.totalorder %s210_s6, %s210_s6 }
  0x2f   : > { %p664_p6 = scmp.lt.s32.totalorder %s662_s4, %s655_s26 }
  0x30   : > { %p658_p3 = pnand %p656_p13, %p961_p4 }
  0x31   : > { %p665_p2 = por %p664_p6, %p663_p12 }
  0x32   : > { %p659_p0 = pneg %p658_p3 }
  0x34   : > { %p666_p5 = pnand %p665_p2, %p659_p0 }
  0x36   : > { %669 = shalt.err (!%p666_p5)
}
  0x37   : > { %p1115_p7 = scmp.ne.s32.totalorder %s1112_s30, 0  ;;  %p235_p8 = scmp.lt.s32.totalorder %s837_s19, 3 }
  0x38   : > { %p1116_p9 = scmp.ge.s32.totalorder %s837_s19, 1  ;;  %s840_s10 = smov [#allocation3]  }
  0x39   : > { %550 = dma.hbm_to_vmem [thread:$0]  (!%p1115_p7), %s1113_s1, 128, %s210_s6, %s951_s7  }
  0x3a   : > { %p981_p13 = pnand %p1116_p9, %p235_p8  ;;  %s188_s11 = sshll.u32 %s840_s10, 4  ;;  %s189_s11 = int_to_ptr.vmem [resolvable:$true] %s188_s11 }
  0x3b   : > { %s670_s25 = scalar_lea.hbm %s1097_s0, 128 }
  0x3c   : > { %s1117_s9 = scalar_select %p981_p13, 1, 0 }
  0x3d   : > { %p671_p6 = scmp.ne.s32.totalorder %s1097_s0, %s670_s25  ;;  %p677_p2 = scmp.lt.u32.totalorder %s670_s25, %s670_s25 }
  0x3e   : > { %p679_p3 = scmp.lt.u32.totalorder %s670_s25, %s1097_s0 }
  0x3f   : > { %p673_p12 = pnand %p671_p6, %p961_p4 }
  0x40   : > { %p680_p10 = por %p679_p3, %p677_p2 }
  0x41   : > { %p674_p0 = pneg %p673_p12 }
  0x43   : > { %p681_p11 = pnand %p680_p10, %p674_p0 }
  0x45   : > { %684 = shalt.err (!%p681_p11)
}
  0x46   : > { %s685_s8 = scalar_lea.vmem %s189_s11, 128  ;;  %s692_s10 = scalar_lea.vmem %s189_s11, 256 }
  0x47   : > { %p686_p1 = scmp.ne.s32.totalorder %s189_s11, %s685_s8  ;;  %p693_p9 = scmp.lt.s32.totalorder %s189_s11, %s189_s11 }
  0x48   : > { %p694_p13 = scmp.lt.s32.totalorder %s692_s10, %s685_s8 }
  0x49   : > { %p688_p5 = pnand %p686_p1, %p961_p4 }
  0x4a   : > { %p695_p7 = por %p694_p13, %p693_p9 }
  0x4b   : > { %p689_p8 = pneg %p688_p5 }
  0x4d   : > { %p696_p6 = pnand %p695_p7, %p689_p8 }
  0x4f   : > { %699 = shalt.err (!%p696_p6)
}
  0x50   : > { %p1118_p12 = scmp.ne.s32.totalorder %s1112_s30, 0  ;;  %s841_s25 = smov [#allocation8]  }
  0x51   : > { %s230_s26 = sshll.u32 %s841_s25, 4  ;;  %s700_s5 = scalar_lea.hbm %s1099_s2, 128  ;;  %s231_s26 = int_to_ptr.vmem [resolvable:$true] %s230_s26 }
  0x52   : > { %547 = dma.hbm_to_vmem [thread:$0]  (!%p1118_p12), %s1097_s0, 128, %s189_s11, [#allocation4]  }
  0x53   : > { %p701_p13 = scmp.ne.s32.totalorder %s1099_s2, %s700_s5  ;;  %p707_p2 = scmp.lt.u32.totalorder %s700_s5, %s700_s5 }
  0x54   : > { %p709_p3 = scmp.lt.u32.totalorder %s700_s5, %s1099_s2 }
  0x55   : > { %p703_p7 = pnand %p701_p13, %p961_p4 }
  0x56   : > { %p710_p10 = por %p709_p3, %p707_p2 }
  0x57   : > { %p704_p0 = pneg %p703_p7 }
  0x59   : > { %p711_p11 = pnand %p710_p10, %p704_p0 }
  0x5b   : > { %714 = shalt.err (!%p711_p11)
}
  0x5c   : > { %s715_s11 = scalar_lea.vmem %s231_s26, 128  ;;  %s722_s15 = scalar_lea.vmem %s231_s26, 256 }
  0x5d   : > { %p716_p1 = scmp.ne.s32.totalorder %s231_s26, %s715_s11  ;;  %p723_p9 = scmp.lt.s32.totalorder %s231_s26, %s231_s26 }
  0x5e   : > { %p724_p6 = scmp.lt.s32.totalorder %s722_s15, %s715_s11 }
  0x5f   : > { %p718_p5 = pnand %p716_p1, %p961_p4 }
  0x60   : > { %p725_p12 = por %p724_p6, %p723_p9 }
  0x61   : > { %p719_p8 = pneg %p718_p5 }
  0x63   : > { %p726_p13 = pnand %p725_p12, %p719_p8 }
  0x65   : > { %729 = shalt.err (!%p726_p13)
}
  0x66   : > { %p1119_p7 = scmp.ne.s32.totalorder %s1112_s30, 0  ;;  %p1120_p0 = scmp.ne.s32.totalorder %s1117_s9, 0 }
  0x67   : > { %s241_s21 = sand.u32 (!%p1120_p0), 1, %s825_s16   ;;  %p1121_p4 = scmp.ne.s32.totalorder (!%p1120_p0), %s1109_s24, 0 }
  0x68   : > { %553 = dma.hbm_to_vmem [thread:$0]  (!%p1119_p7), %s1099_s2, 128, %s231_s26, %s951_s7  }
  0x69   : > { %239 = sbr.rel (%p1120_p0) target bundleno = 459 (0x1cb), region = 32  ;;  %s527_s23 = sshll.u32 (!%p1120_p0), %s241_s21, 3 }
  0x6a   : > { %s242_s25 = scalar_lea.sflag (!%p1120_p0), [#allocation4], %s241_s21  ;;  %s245_s4 = scalar_lea.vmem (!%p1120_p0), [#allocation3], %s527_s23 }
  0x70   : > { %795 = dma.done.wait (%p1121_p4), %s242_s25, 128  }
  0x71   : > { %797 = vsyncadd (%p1121_p4), %s242_s25, 4294967168  ;;  %s250_s30 = sand.u32 1, %s904_s20   ;;  %s254_s5 = scalar_lea.vmem [#allocation6], %s527_s23 }
  0x72   : > { %s251_s6 = scalar_lea.sflag [#allocation7], %s250_s30 }
  0x73   : > { %799 = dma.done.wait (%p1121_p4), %s251_s6, 256  }
  0x74   : > { %801 = vsyncadd (%p1121_p4), %s251_s6, 4294967040  ;;  %vm309_vm0 = vcmask 0   ;;  %v842_v0 = vmov 0.0   ;;  %v311_v1 = vld [vmem:[%s245_s4] sm:$0xff]  ;;  %v312_v2 = vld [vmem:[%s254_s5] sm:$0xff]  ;;  %s263_s7 = scalar_lea.vmem [#allocation8], %s527_s23  ;;  %v345_v13 = vlaneseq }
  0x75   : > { %310 = vst.msk [vmem:[#allocation2] sm:$0x1] %vm309_vm0, %v842_v0  ;;  %v313_v3 = vld [vmem:[%s263_s7] sm:$0xff]  ;;  %v314_v4 = vsub.f32 %v311_v1, %v312_v2  ;;  %v843_v10 = vmov 0   ;;  %p342_p12 = scmp.lt.s32.totalorder %s829_s17, 0  ;;  %p350_p2 = scmp.lt.s32.totalorder %s829_s17, 1 }
  0x76   : > { %v316_v5 = vsub.f32 %v311_v1, %v313_v3  ;;  %634 = vset.pattern.permute.xlu1 %v843_v10  ;;  %635 = vset.pattern.permute.xlu0 %v843_v10  ;;  %v346_v16 = vshrl.u32 %v345_v13, 7  ;;  %s293_s26 = sand.u32 1, %s813_s13   ;;  %s533_s15 = sshll.u32 %s829_s17, 7 }
  0x77   : > { %v315_v6 = vadd.f32 1e-06, %v314_v4  ;;  %s343_s20 = scalar_select %p342_p12, %s829_s17, 0 }
  0x78   : > { %v317_v7 = vadd.f32 1e-06, %v316_v5  ;;  %s351_s9 = scalar_select %p350_p2, 1, 0  ;;  %v374_v40 = vsub.s32 0, %v346_v16 }
  0x79   : > { %v318_v8 = vmul.f32 %v315_v6, %v315_v6  ;;  %s531_s24 = sshll.u32 %s343_s20, 3  ;;  %s530_s8 = sshll.u32 %s293_s26, 3 }
  0x7a   : > { %v328_v9 = vmul.f32 %v317_v7, %v317_v7  ;;  %v347_v17 = vstv %s531_s24  ;;  %v352_v24 = vstv %s351_s9  ;;  %s295_s10 = scalar_lea.vmem [#allocation9], %s530_s8  ;;  %s1046_s21 = scalar_lea.hbm %s1100_s3, %s533_s15 }
  0x7b   : > { %319 = vadd.xlane.f32.xlu0 %v318_v8  ;;  %v348_v21 = vadd.s32 %v347_v17, %v346_v16  ;;  %vm353_vm6 = vcmp.eq.s32.totalorder %v352_v24, 1  ;;  %s395_s11 = sshll.u32 %s295_s10, 4  ;;  %s382_s23 = scalar_lea.sflag [#allocation5], %s293_s26  ;;  %s1041_s11 = int_to_ptr.vmem [resolvable:$true] %s395_s11 }
  0x7c   : > { %v356_v37 = vld [vmem:[#allocation2] sm:$0x1]  ;;  %s730_s25 = scalar_lea.vmem %s1041_s11, 128  ;;  %p1122_p10 = scmp.ne.s32.totalorder %s1110_s28, 0 }
  0x7d   : > { %vm349_vm5 = vcmp.lt.s32.totalorder %v348_v21, 8  ;;  %p731_p3 = scmp.ne.s32.totalorder %s1041_s11, %s730_s25  ;;  %s844_s4 = smov [#allocation9]  }
  0x7e   : > { %vm354_vm7 = vmand %vm349_vm5, %vm353_vm6  ;;  %s734_s17 = sshll.u32 %s844_s4, 4  ;;  %s735_s17 = int_to_ptr.vmem [resolvable:$false] %s734_s17 }
  0x7f   : > { %329 = vadd.xlane.f32.xlu0 %v328_v9  ;;  %p732_p11 = pnand %p731_p3, %p1122_p10  ;;  %s736_s30 = scalar_lea.vmem %s735_s17, 256 }
  0x80   : > { %p737_p5 = scmp.lt.s32.totalorder %s1041_s11, %s735_s17  ;;  %p738_p8 = scmp.lt.s32.totalorder %s736_s30, %s730_s25 }
  0x81   : > { %p733_p1 = pneg %p732_p11 }
  0x82   : > { %p739_p9 = por %p738_p8, %p737_p5 }
  0x84   : > { %p740_p6 = pnand %p739_p9, %p733_p1 }
 0x108   : > { %v320_v11 = vpop.xlane.xlu0 %319 }
 0x109   : > { %636 = vrsqrt.f32 %v320_v11  ;;  %vm323_vm1 = vcmp.eq.f32.partialorder %v320_v11, inf  ;;  %v326_v22 = vand.u32 2147483648, %v320_v11  ;;  %vm325_vm3 = vcmp.eq.f32.partialorder %v320_v11, 0.0 }
 0x10c   : > { %v330_v12 = vpop.xlane.xlu0 %329 }
 0x10d   : > { %638 = vrsqrt.f32 %v330_v12  ;;  %vm333_vm2 = vcmp.eq.f32.partialorder %v330_v12, inf  ;;  %v336_v23 = vand.u32 2147483648, %v330_v12  ;;  %vm335_vm4 = vcmp.eq.f32.partialorder %v330_v12, 0.0 }
 0x113   : > { %v637_v14 = vpop.eup %636 }
 0x114   : > { %v322_v15 = vmul.f32 %v637_v14, %v320_v11 }
 0x116   : > { %v324_v19 = vsel %vm323_vm1, %v320_v11, %v322_v15 }
 0x117   : > { %v639_v18 = vpop.eup %638  ;;  %v327_v26 = vsel %vm325_vm3, %v326_v22, %v324_v19 }
 0x118   : > { %v332_v20 = vmul.f32 %v639_v18, %v330_v12 }
 0x11a   : > { %v334_v25 = vsel %vm333_vm2, %v330_v12, %v332_v20 }
 0x11b   : > { %v337_v27 = vsel %vm335_vm4, %v336_v23, %v334_v25 }
 0x11c   : > { %v338_v28 = vsub.f32 %v327_v26, %v337_v27 }
 0x11e   : > { %v339_v29 = vadd.f32 0.2, %v338_v28 }
 0x120   : > { %v340_v30 = vmax.f32 %v339_v29, 0.0 }
 0x122   : > { %v355_v31 = vsel %vm354_vm7, %v340_v30, 0.0 }
 0x123   : > { %v357_v32 = vrot.slane %v355_v31, 4 }
 0x125   : > { %v358_v33 = vadd.f32 %v357_v32, %v355_v31 }
 0x127   : > { %v359_v34 = vrot.slane %v358_v33, 2 }
 0x129   : > { %v360_v35 = vadd.f32 %v359_v34, %v358_v33 }
 0x12b   : > { %v361_v36 = vrot.slane %v360_v35, 1 }
 0x12d   : > { %v362_v38 = vadd.f32 %v361_v36, %v360_v35 }
 0x12f   : > { %v363_v39 = vadd.f32 %v362_v38, %v356_v37 }
 0x131   : > { %365 = vst.msk [vmem:[#allocation2] sm:$0x1] %vm309_vm0, %v363_v39 }
 0x138   : > { %v369_v41 = vld [vmem:[#allocation2] sm:$0x1] }
 0x139   : > { %v370_v42 = vmul.f32 0.125, %v369_v41 }
 0x13b   : > { %v375_v43 = vrot.slane %v370_v42, %v374_v40 }
 0x13d   : > { %377 = vperm.xlu1 %634, %v375_v43  }
 0x1bc   : > { %v378_v44 = vpop.permute.xlu1 %377 }
 0x1bd   : > { %380 = vst [vmem:[%s295_s10] sm:$0xff] %v378_v44 }
 0x1be   : > { %743 = shalt.err (!%p740_p6)
}
 0x1bf   : > { %s744_s6 = scalar_lea.hbm %s1046_s21, 128  ;;  %s748_s20 = scalar_lea.hbm %s1100_s3, 256 }
 0x1c0   : > { %p745_p13 = scmp.ne.s32.totalorder %s1046_s21, %s744_s6  ;;  %p749_p4 = scmp.lt.u32.totalorder %s1046_s21, %s1100_s3 }
 0x1c1   : > { %p750_p12 = scmp.lt.u32.totalorder %s748_s20, %s744_s6  ;;  %p752_p3 = scmp.lt.u32.totalorder %s744_s6, %s1046_s21 }
 0x1c2   : > { %p746_p7 = pnand %p745_p13, %p1122_p10 }
 0x1c3   : > { %p751_p2 = por %p750_p12, %p749_p4 }
 0x1c4   : > { %p747_p0 = pneg %p746_p7 }
 0x1c5   : > { %p753_p11 = por %p752_p3, %p751_p2 }
 0x1c7   : > { %p754_p1 = pnand %p753_p11, %p747_p0 }
 0x1c9   : > { %757 = shalt.err (!%p754_p1)
}
 0x1ca   : > { %542 = dma.vmem_to_hbm [thread:$0]  (%p1122_p10), %s1041_s11, 128, %s1046_s21, %s382_s23  }
 0x1cb PF: > { %s407_s26 = sand.u32 1, %s809_s12   ;;  %p1123_p5 = scmp.ne.s32.totalorder %s1111_s29, 0 }
 0x1cc   : > { %p1124_p8 = scmp.ge.s32.totalorder %s837_s19, 2  ;;  %s408_s8 = scalar_lea.sflag [#allocation5], %s407_s26 }
 0x1ce   : > { %p555_p9 = pnand %p1124_p8, %p1123_p5 }
 0x1d0   : > { %803 = dma.done.wait (!%p555_p9), %s408_s8, 128  }
 0x1d1   : > { %805 = vsyncadd (!%p555_p9), %s408_s8, 4294967168  ;;  %s22_s19 = sadd.s32 1, %s837_s19   ;;  %s1125_s28 = sld [smem:[#allocation13_spill]] }
 0x1d2   : > { %p19_p6 = scmp.ge.s32.totalorder %s22_s19, 4   ;;  %s1126_s12 = smov %s813_s13 }
 0x1d3   : > { %s1127_s13 = smov %s817_s14  ;;  %s1128_s14 = smov %s926_s27 }
 0x1d4   : > { %s1129_s15 = smov %s825_s16  ;;  %s1087_s16 = smov 0  }
 0x1d5   : > { %s1130_s17 = smov %s833_s18  ;;  %21 = sbr.rel (!%p19_p6) target bundleno = 11 (0xb), region = 109 }
 0x1d7   : > { %s1131_s18 = smov %s1125_s28 }
 0x1dc   :  { %413 = vsyncpa [#allocation4], 1 }
 0x1dd   :  { %415 = vsyncpa [#allocation4 + $0x1], 1 }
 0x1de   :  { %416 = vsyncpa [#allocation7], 1 }
 0x1df   :  { %418 = vsyncpa [#allocation7 + $0x1], 1 }
 0x1e0   :  { %419 = vsyncpa [#allocation5], 1 }
 0x1e1   :  { %421 = vsyncpa [#allocation5 + $0x1], 1 }

</bundles_post_ra>
